<compile_context>
chip_gen: v6e
topology: v6e:2x2x1
jax: 0.10.0
libtpu: 0.0.40
codegen_flags: <defaults>
</compile_context>

<pallas_src>
import functools
import math

import jax
import jax.numpy as jnp
from jax.experimental import pallas as pl
from jax.experimental.pallas import tpu as pltpu


# --------------------------------------------------------------------------
# in-kernel helpers
# --------------------------------------------------------------------------
def _layernorm(x, w, b, eps=1e-5):
    # x: (T, C); w, b: (1, C)  -- PyTorch LayerNorm semantics (biased variance)
    mu = jnp.mean(x, axis=-1, keepdims=True)
    var = jnp.mean((x - mu) ** 2, axis=-1, keepdims=True)
    return (x - mu) * jax.lax.rsqrt(var + eps) * w + b


def _gelu(x):
    # TODO(synk): PyTorch nn.GELU() default is exact erf-GELU; erf lowering is
    # not guaranteed in Mosaic, so the GPT-2 style tanh approximation is used.
    return 0.5 * x * (1.0 + jnp.tanh(0.7978845608028654 * (x + 0.044715 * x * x * x)))


def _vmem_limit_bytes():
    # Generation-aware scoped-VMEM budget (v5e/v6e: up to 100 MiB, v7x: ~56 MiB).
    try:
        cap = pltpu.get_tpu_info().vmem_capacity_bytes
    except Exception:
        cap = 64 * 1024 * 1024
    return int(max(32 * 1024 * 1024, min(cap - 8 * 1024 * 1024, 100 * 1024 * 1024)))


# --------------------------------------------------------------------------
# transformer Block kernel: LN1 -> causal MHSA -> residual -> LN2 -> MLP -> residual
# one grid step per batch element
# --------------------------------------------------------------------------
def block_kernel(x_ref,
                 ln1w_ref, ln1b_ref,
                 wqkv_ref, bqkv_ref,
                 wp_ref, bp_ref,
                 ln2w_ref, ln2b_ref,
                 w1_ref, b1_ref, w2_ref, b2_ref,
                 xo_ref, *rest, n_head, emit_att):
    if emit_att:
        att_ref, y_scr = rest
    else:
        (y_scr,) = rest
        att_ref = None

    x = x_ref[0]                                 # (T, C) f32
    T, C = x.shape
    hd = C // n_head
    scale = 1.0 / math.sqrt(hd)
    bf16 = jnp.bfloat16

    # ---- ln1 + fused QKV projection (single bf16 MXU matmul, f32 accumulate) ----
    h = _layernorm(x, ln1w_ref[...], ln1b_ref[...])
    qkv = jnp.dot(h.astype(bf16), wqkv_ref[...],
                  preferred_element_type=jnp.float32) + bqkv_ref[...]
    q = qkv[:, 0 * C:1 * C] * scale              # fold 1/sqrt(hd) into q
    k = qkv[:, 1 * C:2 * C]
    v = qkv[:, 2 * C:3 * C]

    # causal mask (lower-triangular); n_unmasked = 0
    row = jax.lax.broadcasted_iota(jnp.int32, (T, T), 0)
    col = jax.lax.broadcasted_iota(jnp.int32, (T, T), 1)
    causal = col <= row

    # ---- per-head attention (static unrolled loop over heads) ----
    for i in range(n_head):
        lo, hi = i * hd, (i + 1) * hd
        qh = q[:, lo:hi].astype(bf16)            # each slice read exactly once
        kh = k[:, lo:hi].astype(bf16)
        vh = v[:, lo:hi].astype(bf16)
        s = jnp.dot(qh, kh.T, preferred_element_type=jnp.float32)
        s = jnp.where(causal, s, -jnp.inf)
        s = s - jnp.max(s, axis=-1, keepdims=True)
        e = jnp.exp(s)
        inv = pl.reciprocal(jnp.sum(e, axis=-1, keepdims=True), approx=True)
        a = e * inv                              # softmax over keys, f32
        if emit_att:
            att_ref[0, i] = a                    # only last block writes att to HBM
        yh = jnp.dot(a.astype(bf16), vh, preferred_element_type=jnp.float32)
        y_scr[:, lo:hi] = yh                     # concat heads into VMEM scratch

    # ---- single full-K output projection ----
    y = jnp.dot(y_scr[...].astype(bf16), wp_ref[...],
                preferred_element_type=jnp.float32) + bp_ref[...]
    x = x + y                                    # residual 1

    # ---- MLP ----
    h2 = _layernorm(x, ln2w_ref[...], ln2b_ref[...])
    m = jnp.dot(h2.astype(bf16), w1_ref[...],
                preferred_element_type=jnp.float32) + b1_ref[...]
    m = _gelu(m)
    m = jnp.dot(m.astype(bf16), w2_ref[...],
                preferred_element_type=jnp.float32) + b2_ref[...]
    xo_ref[0] = x + m                            # residual 2


# --------------------------------------------------------------------------
# final LayerNorm + lm head (no bias) kernel, tiled over the vocab dimension
# --------------------------------------------------------------------------
def head_kernel(x_ref, lnw_ref, lnb_ref, wh_ref, out_ref):
    x = x_ref[0]                                 # (T, C)
    h = _layernorm(x, lnw_ref[...], lnb_ref[...])
    out_ref[0] = jnp.dot(h.astype(jnp.bfloat16), wh_ref[...],
                         preferred_element_type=jnp.float32)


def _pick_vocab_tile(V, max_tile=4096):
    if V <= max_tile:
        return V
    for tv in range(max_tile, 127, -128):        # lane-dense tiles that divide V
        if V % tv == 0:
            return tv
    return V                                     # fallback: single tile


# --------------------------------------------------------------------------
# wrappers
# --------------------------------------------------------------------------
def run_block(x, p, n_head, *, emit_att, vmem_limit):
    B, T, C = x.shape
    kern = functools.partial(block_kernel, n_head=n_head, emit_att=emit_att)

    def rep(shape):
        # constant index_map -> weight block is DMA'd once, never re-fetched
        return pl.BlockSpec(shape, lambda b: (0,) * len(shape))

    in_specs = [
        pl.BlockSpec((1, T, C), lambda b: (b, 0, 0)),       # x
        rep((1, C)), rep((1, C)),                           # ln1 w/b
        rep((C, 3 * C)), rep((1, 3 * C)),                   # fused Wqkv / bqkv
        rep((C, C)), rep((1, C)),                           # Wproj / bproj
        rep((1, C)), rep((1, C)),                           # ln2 w/b
        rep((C, 4 * C)), rep((1, 4 * C)),                   # fc1
        rep((4 * C, C)), rep((1, C)),                       # fc2
    ]
    x_spec = pl.BlockSpec((1, T, C), lambda b: (b, 0, 0))
    x_struct = jax.ShapeDtypeStruct((B, T, C), jnp.float32)
    if emit_att:
        out_specs = (x_spec, pl.BlockSpec((1, n_head, T, T), lambda b: (b, 0, 0, 0)))
        out_shape = (x_struct, jax.ShapeDtypeStruct((B, n_head, T, T), jnp.float32))
    else:
        out_specs = x_spec
        out_shape = x_struct

    result = pl.pallas_call(
        kern,
        grid=(B,),
        in_specs=in_specs,
        out_specs=out_specs,
        out_shape=out_shape,
        scratch_shapes=[pltpu.VMEM((T, C), jnp.float32)],   # head-concat scratch
        compiler_params=pltpu.CompilerParams(
            dimension_semantics=("parallel",),
            vmem_limit_bytes=vmem_limit),
    )(x,
      p["ln1_w"], p["ln1_b"],
      p["w_qkv"], p["b_qkv"],
      p["w_proj"], p["b_proj"],
      p["ln2_w"], p["ln2_b"],
      p["w_fc1"], p["b_fc1"],
      p["w_fc2"], p["b_fc2"])

    if emit_att:
        x_out, att = result
        return x_out, att
    return result, None


def run_head(x, lnw, lnb, wh, *, vmem_limit):
    B, T, C = x.shape
    V = wh.shape[1]
    tv = _pick_vocab_tile(V)
    nv = V // tv if V % tv == 0 else 1
    return pl.pallas_call(
        head_kernel,
        grid=(B, nv),
        in_specs=[
            pl.BlockSpec((1, T, C), lambda b, j: (b, 0, 0)),
            pl.BlockSpec((1, C), lambda b, j: (0, 0)),
            pl.BlockSpec((1, C), lambda b, j: (0, 0)),
            pl.BlockSpec((C, tv), lambda b, j: (0, j)),
        ],
        out_specs=pl.BlockSpec((1, T, tv), lambda b, j: (b, 0, j)),
        out_shape=jax.ShapeDtypeStruct((B, T, V), jnp.float32),
        compiler_params=pltpu.CompilerParams(
            dimension_semantics=("parallel", "parallel"),
            vmem_limit_bytes=vmem_limit),
    )(x, lnw, lnb, wh)


def gpt_class_forward(idx, token, params, n_head):
    """Returns (logits, loss, att) matching GPTClass.forward(idx, token) (targets=None)."""
    # glue: embedding gathers + class-token concat + positional add (pure JAX)
    cls = params["cls_emb"][token]               # (B, Tc, C)
    tok = params["tok_emb"][idx]                 # (B, T, C)
    t = cls.shape[1] + tok.shape[1]
    assert t <= params["pos_emb"].shape[0], "Cannot forward, model block size is exhausted."
    x = jnp.concatenate([cls, tok], axis=1) + params["pos_emb"][:t][None, :, :]
    # embd dropout -> identity (eval semantics)

    vmem_limit = _vmem_limit_bytes()
    att = None
    n_blocks = len(params["blocks"])
    for li, blk in enumerate(params["blocks"]):
        emit_att = (li == n_blocks - 1)          # only the last block's att is returned
        x, a = run_block(x, blk, n_head, emit_att=emit_att, vmem_limit=vmem_limit)
        if a is not None:
            att = a

    logits = run_head(x, params["ln_f_w"], params["ln_f_b"], params["head_w"],
                      vmem_limit=vmem_limit)
    return logits, None, att


# --------------------------------------------------------------------------
# deterministic parameter init (mirrors GPT._init_weights: N(0, 0.02) weights,
# zero biases, LayerNorm weight=1 bias=0, pos_emb zeros). Matmul weights bf16.
# When porting real PyTorch weights: w_qkv = concat([Wq.T, Wk.T, Wv.T], axis=1).
# --------------------------------------------------------------------------
def init_params(key, vocab_size, block_size, class_size, n_layer, n_head, n_embd):
    C = n_embd
    keys = iter(jax.random.split(key, 3 + 4 * n_layer))

    def nrm(shape, dtype=jnp.bfloat16):
        return (0.02 * jax.random.normal(next(keys), shape, dtype=jnp.float32)).astype(dtype)

    params = {
        "tok_emb": nrm((vocab_size, C), jnp.float32),
        "cls_emb": nrm((class_size, C), jnp.float32),
        "pos_emb": jnp.zeros((block_size, C), jnp.float32),
        "ln_f_w": jnp.ones((1, C), jnp.float32),
        "ln_f_b": jnp.zeros((1, C), jnp.float32),
        "blocks": [],
    }
    for _ in range(n_layer):
        blk = {
            "ln1_w": jnp.ones((1, C), jnp.float32),
            "ln1_b": jnp.zeros((1, C), jnp.float32),
            "w_qkv": nrm((C, 3 * C)), "b_qkv": jnp.zeros((1, 3 * C), jnp.float32),
            "w_proj": nrm((C, C)), "b_proj": jnp.zeros((1, C), jnp.float32),
            "ln2_w": jnp.ones((1, C), jnp.float32),
            "ln2_b": jnp.zeros((1, C), jnp.float32),
            "w_fc1": nrm((C, 4 * C)), "b_fc1": jnp.zeros((1, 4 * C), jnp.float32),
            "w_fc2": nrm((4 * C, C)), "b_fc2": jnp.zeros((1, C), jnp.float32),
        }
        params["blocks"].append(blk)
    params["head_w"] = nrm((C, vocab_size))      # head: Linear(n_embd, vocab, bias=False)
    return params


# --------------------------------------------------------------------------
# pure-JAX reference with the same math (bf16 matmul operands, f32 accumulate)
# --------------------------------------------------------------------------
def _ref_forward(idx, token, params, n_head):
    def ln(x, w, b):
        mu = x.mean(-1, keepdims=True)
        var = ((x - mu) ** 2).mean(-1, keepdims=True)
        return (x - mu) * jax.lax.rsqrt(var + 1e-5) * w + b

    bf16 = jnp.bfloat16

    def mm(a, w):
        return jnp.dot(a.astype(bf16), w, preferred_element_type=jnp.float32)

    cls = params["cls_emb"][token]
    tok = params["tok_emb"][idx]
    t = cls.shape[1] + tok.shape[1]
    x = jnp.concatenate([cls, tok], axis=1) + params["pos_emb"][:t][None]
    B, T, C = x.shape
    hd = C // n_head
    mask = jnp.tril(jnp.ones((T, T), bool))
    att = None
    for p in params["blocks"]:
        h = ln(x, p["ln1_w"], p["ln1_b"])
        qkv = mm(h, p["w_qkv"]) + p["b_qkv"]
        q = (qkv[..., 0:C] / math.sqrt(hd)).reshape(B, T, n_head, hd).transpose(0, 2, 1, 3)
        k = qkv[..., C:2 * C].reshape(B, T, n_head, hd).transpose(0, 2, 1, 3)
        v = qkv[..., 2 * C:3 * C].reshape(B, T, n_head, hd).transpose(0, 2, 1, 3)
        s = jnp.einsum("bhqd,bhkd->bhqk", q.astype(bf16), k.astype(bf16),
                       preferred_element_type=jnp.float32)
        s = jnp.where(mask[None, None], s, -jnp.inf)
        att = jax.nn.softmax(s, axis=-1)
        y = jnp.einsum("bhqk,bhkd->bhqd", att.astype(bf16), v.astype(bf16),
                       preferred_element_type=jnp.float32)
        y = y.transpose(0, 2, 1, 3).reshape(B, T, C)
        x = x + (mm(y, p["w_proj"]) + p["b_proj"])
        h2 = ln(x, p["ln2_w"], p["ln2_b"])
        m = _gelu(mm(h2, p["w_fc1"]) + p["b_fc1"])
        x = x + (mm(m, p["w_fc2"]) + p["b_fc2"])
    x = ln(x, params["ln_f_w"], params["ln_f_b"])
    return mm(x, params["head_w"]), att


# --------------------------------------------------------------------------
if __name__ == "__main__":
    key = jax.random.PRNGKey(0)
    k_params, k_idx, k_tok = jax.random.split(key, 3)

    vocab_size, block_size, class_size = 64, 16, 10
    n_layer, n_head, n_embd = 2, 4, 32
    B, T_idx, T_cls = 2, 7, 1                    # total sequence = 8

    params = init_params(k_params, vocab_size, block_size, class_size,
                         n_layer, n_head, n_embd)
    idx = jax.random.randint(k_idx, (B, T_idx), 0, vocab_size, dtype=jnp.int32)
    token = jax.random.randint(k_tok, (B, T_cls), 0, class_size, dtype=jnp.int32)

    logits, loss, att = gpt_class_forward(idx, token, params, n_head)
    jax.block_until_ready((logits, att))

    # sanity check against pure-JAX reference (same bf16-matmul math)
    ref_logits, ref_att = _ref_forward(idx, token, params, n_head)
    T_total = T_idx + T_cls
    assert logits.shape == (B, T_total, vocab_size)
    assert att.shape == (B, n_head, T_total, T_total)
    assert loss is None
    assert jnp.allclose(logits, ref_logits, atol=1e-2, rtol=1e-2)
    assert jnp.allclose(att, ref_att, atol=1e-2, rtol=1e-2)

    print("KERNEL_OK")
</pallas_src>

<mosaic_0001>
module attributes {stable_mosaic.version = 11 : i64} {
  func.func @block_kernel(%arg0: i32, %arg1: memref<1x8x32xf32, #tpu.memory_space<vmem>>, %arg2: memref<1x32xf32, #tpu.memory_space<vmem>>, %arg3: memref<1x32xf32, #tpu.memory_space<vmem>>, %arg4: memref<32x96xbf16, #tpu.memory_space<vmem>>, %arg5: memref<1x96xf32, #tpu.memory_space<vmem>>, %arg6: memref<32x32xbf16, #tpu.memory_space<vmem>>, %arg7: memref<1x32xf32, #tpu.memory_space<vmem>>, %arg8: memref<1x32xf32, #tpu.memory_space<vmem>>, %arg9: memref<1x32xf32, #tpu.memory_space<vmem>>, %arg10: memref<32x128xbf16, #tpu.memory_space<vmem>>, %arg11: memref<1x128xf32, #tpu.memory_space<vmem>>, %arg12: memref<128x32xbf16, #tpu.memory_space<vmem>>, %arg13: memref<1x32xf32, #tpu.memory_space<vmem>>, %arg14: memref<1x8x32xf32, #tpu.memory_space<vmem>>, %arg15: memref<8x32xf32, #tpu.memory_space<vmem>>) attributes {dimension_semantics = [#tpu.dimension_semantics<parallel>], iteration_bounds = array<i64: 2>, scalar_prefetch = 0 : i64, scratch_operands = 1 : i64, tpu.core_type = #tpu.core_type<tc>, window_params = [{transform_indices = @transform_0, window_bounds = array<i64: 1, 8, 32>}, {pipeline_mode = #tpu.pipeline_mode<synchronous>, transform_indices = @transform_1, window_bounds = array<i64: 1, 32>}, {pipeline_mode = #tpu.pipeline_mode<synchronous>, transform_indices = @transform_2, window_bounds = array<i64: 1, 32>}, {pipeline_mode = #tpu.pipeline_mode<synchronous>, transform_indices = @transform_3, window_bounds = array<i64: 32, 96>}, {pipeline_mode = #tpu.pipeline_mode<synchronous>, transform_indices = @transform_4, window_bounds = array<i64: 1, 96>}, {pipeline_mode = #tpu.pipeline_mode<synchronous>, transform_indices = @transform_5, window_bounds = array<i64: 32, 32>}, {pipeline_mode = #tpu.pipeline_mode<synchronous>, transform_indices = @transform_6, window_bounds = array<i64: 1, 32>}, {pipeline_mode = #tpu.pipeline_mode<synchronous>, transform_indices = @transform_7, window_bounds = array<i64: 1, 32>}, {pipeline_mode = #tpu.pipeline_mode<synchronous>, transform_indices = @transform_8, window_bounds = array<i64: 1, 32>}, {pipeline_mode = #tpu.pipeline_mode<synchronous>, transform_indices = @transform_9, window_bounds = array<i64: 32, 128>}, {pipeline_mode = #tpu.pipeline_mode<synchronous>, transform_indices = @transform_10, window_bounds = array<i64: 1, 128>}, {pipeline_mode = #tpu.pipeline_mode<synchronous>, transform_indices = @transform_11, window_bounds = array<i64: 128, 32>}, {pipeline_mode = #tpu.pipeline_mode<synchronous>, transform_indices = @transform_12, window_bounds = array<i64: 1, 32>}, {transform_indices = @transform_13, window_bounds = array<i64: 1, 8, 32>}]} {
    %c0 = arith.constant 0 : index
    %c0_0 = arith.constant 0 : index
    %c0_1 = arith.constant 0 : index
    %0 = vector.load %arg1[%c0, %c0_0, %c0_1] : memref<1x8x32xf32, #tpu.memory_space<vmem>>, vector<1x8x32xf32>
    %1 = vector.shape_cast %0 : vector<1x8x32xf32> to vector<8x32xf32>
    %c0_2 = arith.constant 0 : index
    %c0_3 = arith.constant 0 : index
    %2 = vector.load %arg2[%c0_2, %c0_3] : memref<1x32xf32, #tpu.memory_space<vmem>>, vector<1x32xf32>
    %c0_4 = arith.constant 0 : index
    %c0_5 = arith.constant 0 : index
    %3 = vector.load %arg3[%c0_4, %c0_5] : memref<1x32xf32, #tpu.memory_space<vmem>>, vector<1x32xf32>
    %cst = arith.constant dense<0.000000e+00> : vector<8xf32>
    %4 = vector.multi_reduction <add>, %1, %cst [1] : vector<8x32xf32> to vector<8xf32>
    %5 = vector.shape_cast %4 : vector<8xf32> to vector<8x1xf32>
    %cst_6 = arith.constant 3.200000e+01 : f32
    %6 = vector.broadcast %cst_6 : f32 to vector<8x1xf32>
    %7 = arith.divf %5, %6 : vector<8x1xf32>
    %8 = vector.broadcast %7 : vector<8x1xf32> to vector<8x32xf32>
    %9 = arith.subf %1, %8 : vector<8x32xf32>
    %10 = arith.mulf %9, %9 : vector<8x32xf32>
    %cst_7 = arith.constant dense<0.000000e+00> : vector<8xf32>
    %11 = vector.multi_reduction <add>, %10, %cst_7 [1] : vector<8x32xf32> to vector<8xf32>
    %12 = vector.shape_cast %11 : vector<8xf32> to vector<8x1xf32>
    %cst_8 = arith.constant 3.200000e+01 : f32
    %13 = vector.broadcast %cst_8 : f32 to vector<8x1xf32>
    %14 = arith.divf %12, %13 : vector<8x1xf32>
    %15 = vector.broadcast %7 : vector<8x1xf32> to vector<8x32xf32>
    %16 = arith.subf %1, %15 : vector<8x32xf32>
    %cst_9 = arith.constant 9.99999974E-6 : f32
    %17 = vector.broadcast %cst_9 : f32 to vector<8x1xf32>
    %18 = arith.addf %14, %17 : vector<8x1xf32>
    %19 = math.rsqrt %18 : vector<8x1xf32>
    %20 = vector.broadcast %19 : vector<8x1xf32> to vector<8x32xf32>
    %21 = arith.mulf %16, %20 : vector<8x32xf32>
    %22 = vector.broadcast %2 : vector<1x32xf32> to vector<8x32xf32>
    %23 = arith.mulf %21, %22 : vector<8x32xf32>
    %24 = vector.broadcast %3 : vector<1x32xf32> to vector<8x32xf32>
    %25 = arith.addf %23, %24 : vector<8x32xf32>
    %26 = arith.truncf %25 : vector<8x32xf32> to vector<8x32xbf16>
    %c0_10 = arith.constant 0 : index
    %c0_11 = arith.constant 0 : index
    %27 = vector.load %arg4[%c0_10, %c0_11] : memref<32x96xbf16, #tpu.memory_space<vmem>>, vector<32x96xbf16>
    %cst_12 = arith.constant dense<0.000000e+00> : vector<8x96xf32>
    %28 = tpu.matmul %26, %27, %cst_12 {dimension_numbers = #tpu.dot_dimension_numbers<[1], [0], [0], [1], [0, 0, 1, 1], [], []>} : vector<8x32xbf16>, vector<32x96xbf16>, vector<8x96xf32> -> vector<8x96xf32>
    %c0_13 = arith.constant 0 : index
    %c0_14 = arith.constant 0 : index
    %29 = vector.load %arg5[%c0_13, %c0_14] : memref<1x96xf32, #tpu.memory_space<vmem>>, vector<1x96xf32>
    %30 = vector.broadcast %29 : vector<1x96xf32> to vector<8x96xf32>
    %31 = arith.addf %28, %30 : vector<8x96xf32>
    %32 = vector.extract_strided_slice %31 {offsets = [0, 0], sizes = [8, 32], strides = [1, 1]} : vector<8x96xf32> to vector<8x32xf32>
    %cst_15 = arith.constant 0.353553385 : f32
    %33 = vector.broadcast %cst_15 : f32 to vector<8x32xf32>
    %34 = arith.mulf %32, %33 : vector<8x32xf32>
    %35 = vector.extract_strided_slice %31 {offsets = [0, 32], sizes = [8, 32], strides = [1, 1]} : vector<8x96xf32> to vector<8x32xf32>
    %36 = vector.extract_strided_slice %31 {offsets = [0, 64], sizes = [8, 32], strides = [1, 1]} : vector<8x96xf32> to vector<8x32xf32>
    %37 = tpu.iota {dimensions = array<i32: 0>} : vector<8x8xi32>
    %38 = tpu.iota {dimensions = array<i32: 1>} : vector<8x8xi32>
    %39 = arith.cmpi sle, %38, %37 : vector<8x8xi32>
    %40 = vector.extract_strided_slice %34 {offsets = [0, 0], sizes = [8, 8], strides = [1, 1]} : vector<8x32xf32> to vector<8x8xf32>
    %41 = arith.truncf %40 : vector<8x8xf32> to vector<8x8xbf16>
    %42 = vector.extract_strided_slice %35 {offsets = [0, 0], sizes = [8, 8], strides = [1, 1]} : vector<8x32xf32> to vector<8x8xf32>
    %43 = arith.truncf %42 : vector<8x8xf32> to vector<8x8xbf16>
    %44 = vector.extract_strided_slice %36 {offsets = [0, 0], sizes = [8, 8], strides = [1, 1]} : vector<8x32xf32> to vector<8x8xf32>
    %45 = arith.truncf %44 : vector<8x8xf32> to vector<8x8xbf16>
    %46 = tpu.transpose %43, [1, 0] : vector<8x8xbf16> -> vector<8x8xbf16>
    %cst_16 = arith.constant dense<0.000000e+00> : vector<8x8xf32>
    %47 = tpu.matmul %41, %46, %cst_16 {dimension_numbers = #tpu.dot_dimension_numbers<[1], [0], [0], [1], [0, 0, 1, 1], [], []>} : vector<8x8xbf16>, vector<8x8xbf16>, vector<8x8xf32> -> vector<8x8xf32>
    %cst_17 = arith.constant 0xFF800000 : f32
    %48 = vector.broadcast %cst_17 : f32 to vector<8x8xf32>
    %49 = arith.select %39, %47, %48 : vector<8x8xi1>, vector<8x8xf32>
    %cst_18 = arith.constant dense<0xFF800000> : vector<8xf32>
    %50 = vector.multi_reduction <maximumf>, %49, %cst_18 [1] : vector<8x8xf32> to vector<8xf32>
    %51 = vector.shape_cast %50 : vector<8xf32> to vector<8x1xf32>
    %52 = vector.broadcast %51 : vector<8x1xf32> to vector<8x8xf32>
    %53 = arith.subf %49, %52 : vector<8x8xf32>
    %54 = math.exp %53 : vector<8x8xf32>
    %cst_19 = arith.constant dense<0.000000e+00> : vector<8xf32>
    %55 = vector.multi_reduction <add>, %54, %cst_19 [1] : vector<8x8xf32> to vector<8xf32>
    %56 = vector.shape_cast %55 : vector<8xf32> to vector<8x1xf32>
    %57 = tpu.reciprocal %56 {approx = true} : vector<8x1xf32> -> vector<8x1xf32>
    %58 = vector.broadcast %57 : vector<8x1xf32> to vector<8x8xf32>
    %59 = arith.mulf %54, %58 : vector<8x8xf32>
    %60 = arith.truncf %59 : vector<8x8xf32> to vector<8x8xbf16>
    %cst_20 = arith.constant dense<0.000000e+00> : vector<8x8xf32>
    %61 = tpu.matmul %60, %45, %cst_20 {dimension_numbers = #tpu.dot_dimension_numbers<[1], [0], [0], [1], [0, 0, 1, 1], [], []>} : vector<8x8xbf16>, vector<8x8xbf16>, vector<8x8xf32> -> vector<8x8xf32>
    %c0_21 = arith.constant 0 : index
    %c0_22 = arith.constant 0 : index
    %62 = vector.load %arg15[%c0_21, %c0_22] : memref<8x32xf32, #tpu.memory_space<vmem>>, vector<8x8xf32>
    tpu.vector_store %arg15[%c0_21, %c0_22], %61 {strides = array<i32>} : memref<8x32xf32, #tpu.memory_space<vmem>>, vector<8x8xf32>,
    %63 = vector.extract_strided_slice %34 {offsets = [0, 8], sizes = [8, 8], strides = [1, 1]} : vector<8x32xf32> to vector<8x8xf32>
    %64 = arith.truncf %63 : vector<8x8xf32> to vector<8x8xbf16>
    %65 = vector.extract_strided_slice %35 {offsets = [0, 8], sizes = [8, 8], strides = [1, 1]} : vector<8x32xf32> to vector<8x8xf32>
    %66 = arith.truncf %65 : vector<8x8xf32> to vector<8x8xbf16>
    %67 = vector.extract_strided_slice %36 {offsets = [0, 8], sizes = [8, 8], strides = [1, 1]} : vector<8x32xf32> to vector<8x8xf32>
    %68 = arith.truncf %67 : vector<8x8xf32> to vector<8x8xbf16>
    %69 = tpu.transpose %66, [1, 0] : vector<8x8xbf16> -> vector<8x8xbf16>
    %cst_23 = arith.constant dense<0.000000e+00> : vector<8x8xf32>
    %70 = tpu.matmul %64, %69, %cst_23 {dimension_numbers = #tpu.dot_dimension_numbers<[1], [0], [0], [1], [0, 0, 1, 1], [], []>} : vector<8x8xbf16>, vector<8x8xbf16>, vector<8x8xf32> -> vector<8x8xf32>
    %cst_24 = arith.constant 0xFF800000 : f32
    %71 = vector.broadcast %cst_24 : f32 to vector<8x8xf32>
    %72 = arith.select %39, %70, %71 : vector<8x8xi1>, vector<8x8xf32>
    %cst_25 = arith.constant dense<0xFF800000> : vector<8xf32>
    %73 = vector.multi_reduction <maximumf>, %72, %cst_25 [1] : vector<8x8xf32> to vector<8xf32>
    %74 = vector.shape_cast %73 : vector<8xf32> to vector<8x1xf32>
    %75 = vector.broadcast %74 : vector<8x1xf32> to vector<8x8xf32>
    %76 = arith.subf %72, %75 : vector<8x8xf32>
    %77 = math.exp %76 : vector<8x8xf32>
    %cst_26 = arith.constant dense<0.000000e+00> : vector<8xf32>
    %78 = vector.multi_reduction <add>, %77, %cst_26 [1] : vector<8x8xf32> to vector<8xf32>
    %79 = vector.shape_cast %78 : vector<8xf32> to vector<8x1xf32>
    %80 = tpu.reciprocal %79 {approx = true} : vector<8x1xf32> -> vector<8x1xf32>
    %81 = vector.broadcast %80 : vector<8x1xf32> to vector<8x8xf32>
    %82 = arith.mulf %77, %81 : vector<8x8xf32>
    %83 = arith.truncf %82 : vector<8x8xf32> to vector<8x8xbf16>
    %cst_27 = arith.constant dense<0.000000e+00> : vector<8x8xf32>
    %84 = tpu.matmul %83, %68, %cst_27 {dimension_numbers = #tpu.dot_dimension_numbers<[1], [0], [0], [1], [0, 0, 1, 1], [], []>} : vector<8x8xbf16>, vector<8x8xbf16>, vector<8x8xf32> -> vector<8x8xf32>
    %c0_28 = arith.constant 0 : index
    %c8 = arith.constant 8 : index
    %85 = vector.load %arg15[%c0_28, %c8] : memref<8x32xf32, #tpu.memory_space<vmem>>, vector<8x8xf32>
    tpu.vector_store %arg15[%c0_28, %c8], %84 {strides = array<i32>} : memref<8x32xf32, #tpu.memory_space<vmem>>, vector<8x8xf32>,
    %86 = vector.extract_strided_slice %34 {offsets = [0, 16], sizes = [8, 8], strides = [1, 1]} : vector<8x32xf32> to vector<8x8xf32>
    %87 = arith.truncf %86 : vector<8x8xf32> to vector<8x8xbf16>
    %88 = vector.extract_strided_slice %35 {offsets = [0, 16], sizes = [8, 8], strides = [1, 1]} : vector<8x32xf32> to vector<8x8xf32>
    %89 = arith.truncf %88 : vector<8x8xf32> to vector<8x8xbf16>
    %90 = vector.extract_strided_slice %36 {offsets = [0, 16], sizes = [8, 8], strides = [1, 1]} : vector<8x32xf32> to vector<8x8xf32>
    %91 = arith.truncf %90 : vector<8x8xf32> to vector<8x8xbf16>
    %92 = tpu.transpose %89, [1, 0] : vector<8x8xbf16> -> vector<8x8xbf16>
    %cst_29 = arith.constant dense<0.000000e+00> : vector<8x8xf32>
    %93 = tpu.matmul %87, %92, %cst_29 {dimension_numbers = #tpu.dot_dimension_numbers<[1], [0], [0], [1], [0, 0, 1, 1], [], []>} : vector<8x8xbf16>, vector<8x8xbf16>, vector<8x8xf32> -> vector<8x8xf32>
    %cst_30 = arith.constant 0xFF800000 : f32
    %94 = vector.broadcast %cst_30 : f32 to vector<8x8xf32>
    %95 = arith.select %39, %93, %94 : vector<8x8xi1>, vector<8x8xf32>
    %cst_31 = arith.constant dense<0xFF800000> : vector<8xf32>
    %96 = vector.multi_reduction <maximumf>, %95, %cst_31 [1] : vector<8x8xf32> to vector<8xf32>
    %97 = vector.shape_cast %96 : vector<8xf32> to vector<8x1xf32>
    %98 = vector.broadcast %97 : vector<8x1xf32> to vector<8x8xf32>
    %99 = arith.subf %95, %98 : vector<8x8xf32>
    %100 = math.exp %99 : vector<8x8xf32>
    %cst_32 = arith.constant dense<0.000000e+00> : vector<8xf32>
    %101 = vector.multi_reduction <add>, %100, %cst_32 [1] : vector<8x8xf32> to vector<8xf32>
    %102 = vector.shape_cast %101 : vector<8xf32> to vector<8x1xf32>
    %103 = tpu.reciprocal %102 {approx = true} : vector<8x1xf32> -> vector<8x1xf32>
    %104 = vector.broadcast %103 : vector<8x1xf32> to vector<8x8xf32>
    %105 = arith.mulf %100, %104 : vector<8x8xf32>
    %106 = arith.truncf %105 : vector<8x8xf32> to vector<8x8xbf16>
    %cst_33 = arith.constant dense<0.000000e+00> : vector<8x8xf32>
    %107 = tpu.matmul %106, %91, %cst_33 {dimension_numbers = #tpu.dot_dimension_numbers<[1], [0], [0], [1], [0, 0, 1, 1], [], []>} : vector<8x8xbf16>, vector<8x8xbf16>, vector<8x8xf32> -> vector<8x8xf32>
    %c0_34 = arith.constant 0 : index
    %c16 = arith.constant 16 : index
    %108 = vector.load %arg15[%c0_34, %c16] : memref<8x32xf32, #tpu.memory_space<vmem>>, vector<8x8xf32>
    tpu.vector_store %arg15[%c0_34, %c16], %107 {strides = array<i32>} : memref<8x32xf32, #tpu.memory_space<vmem>>, vector<8x8xf32>,
    %109 = vector.extract_strided_slice %34 {offsets = [0, 24], sizes = [8, 8], strides = [1, 1]} : vector<8x32xf32> to vector<8x8xf32>
    %110 = arith.truncf %109 : vector<8x8xf32> to vector<8x8xbf16>
    %111 = vector.extract_strided_slice %35 {offsets = [0, 24], sizes = [8, 8], strides = [1, 1]} : vector<8x32xf32> to vector<8x8xf32>
    %112 = arith.truncf %111 : vector<8x8xf32> to vector<8x8xbf16>
    %113 = vector.extract_strided_slice %36 {offsets = [0, 24], sizes = [8, 8], strides = [1, 1]} : vector<8x32xf32> to vector<8x8xf32>
    %114 = arith.truncf %113 : vector<8x8xf32> to vector<8x8xbf16>
    %115 = tpu.transpose %112, [1, 0] : vector<8x8xbf16> -> vector<8x8xbf16>
    %cst_35 = arith.constant dense<0.000000e+00> : vector<8x8xf32>
    %116 = tpu.matmul %110, %115, %cst_35 {dimension_numbers = #tpu.dot_dimension_numbers<[1], [0], [0], [1], [0, 0, 1, 1], [], []>} : vector<8x8xbf16>, vector<8x8xbf16>, vector<8x8xf32> -> vector<8x8xf32>
    %cst_36 = arith.constant 0xFF800000 : f32
    %117 = vector.broadcast %cst_36 : f32 to vector<8x8xf32>
    %118 = arith.select %39, %116, %117 : vector<8x8xi1>, vector<8x8xf32>
    %cst_37 = arith.constant dense<0xFF800000> : vector<8xf32>
    %119 = vector.multi_reduction <maximumf>, %118, %cst_37 [1] : vector<8x8xf32> to vector<8xf32>
    %120 = vector.shape_cast %119 : vector<8xf32> to vector<8x1xf32>
    %121 = vector.broadcast %120 : vector<8x1xf32> to vector<8x8xf32>
    %122 = arith.subf %118, %121 : vector<8x8xf32>
    %123 = math.exp %122 : vector<8x8xf32>
    %cst_38 = arith.constant dense<0.000000e+00> : vector<8xf32>
    %124 = vector.multi_reduction <add>, %123, %cst_38 [1] : vector<8x8xf32> to vector<8xf32>
    %125 = vector.shape_cast %124 : vector<8xf32> to vector<8x1xf32>
    %126 = tpu.reciprocal %125 {approx = true} : vector<8x1xf32> -> vector<8x1xf32>
    %127 = vector.broadcast %126 : vector<8x1xf32> to vector<8x8xf32>
    %128 = arith.mulf %123, %127 : vector<8x8xf32>
    %129 = arith.truncf %128 : vector<8x8xf32> to vector<8x8xbf16>
    %cst_39 = arith.constant dense<0.000000e+00> : vector<8x8xf32>
    %130 = tpu.matmul %129, %114, %cst_39 {dimension_numbers = #tpu.dot_dimension_numbers<[1], [0], [0], [1], [0, 0, 1, 1], [], []>} : vector<8x8xbf16>, vector<8x8xbf16>, vector<8x8xf32> -> vector<8x8xf32>
    %c0_40 = arith.constant 0 : index
    %c24 = arith.constant 24 : index
    %131 = vector.load %arg15[%c0_40, %c24] : memref<8x32xf32, #tpu.memory_space<vmem>>, vector<8x8xf32>
    tpu.vector_store %arg15[%c0_40, %c24], %130 {strides = array<i32>} : memref<8x32xf32, #tpu.memory_space<vmem>>, vector<8x8xf32>,
    %c0_41 = arith.constant 0 : index
    %c0_42 = arith.constant 0 : index
    %132 = vector.load %arg15[%c0_41, %c0_42] : memref<8x32xf32, #tpu.memory_space<vmem>>, vector<8x32xf32>
    %133 = arith.truncf %132 : vector<8x32xf32> to vector<8x32xbf16>
    %c0_43 = arith.constant 0 : index
    %c0_44 = arith.constant 0 : index
    %134 = vector.load %arg6[%c0_43, %c0_44] : memref<32x32xbf16, #tpu.memory_space<vmem>>, vector<32x32xbf16>
    %cst_45 = arith.constant dense<0.000000e+00> : vector<8x32xf32>
    %135 = tpu.matmul %133, %134, %cst_45 {dimension_numbers = #tpu.dot_dimension_numbers<[1], [0], [0], [1], [0, 0, 1, 1], [], []>} : vector<8x32xbf16>, vector<32x32xbf16>, vector<8x32xf32> -> vector<8x32xf32>
    %c0_46 = arith.constant 0 : index
    %c0_47 = arith.constant 0 : index
    %136 = vector.load %arg7[%c0_46, %c0_47] : memref<1x32xf32, #tpu.memory_space<vmem>>, vector<1x32xf32>
    %137 = vector.broadcast %136 : vector<1x32xf32> to vector<8x32xf32>
    %138 = arith.addf %135, %137 : vector<8x32xf32>
    %139 = arith.addf %1, %138 : vector<8x32xf32>
    %c0_48 = arith.constant 0 : index
    %c0_49 = arith.constant 0 : index
    %140 = vector.load %arg8[%c0_48, %c0_49] : memref<1x32xf32, #tpu.memory_space<vmem>>, vector<1x32xf32>
    %c0_50 = arith.constant 0 : index
    %c0_51 = arith.constant 0 : index
    %141 = vector.load %arg9[%c0_50, %c0_51] : memref<1x32xf32, #tpu.memory_space<vmem>>, vector<1x32xf32>
    %cst_52 = arith.constant dense<0.000000e+00> : vector<8xf32>
    %142 = vector.multi_reduction <add>, %139, %cst_52 [1] : vector<8x32xf32> to vector<8xf32>
    %143 = vector.shape_cast %142 : vector<8xf32> to vector<8x1xf32>
    %cst_53 = arith.constant 3.200000e+01 : f32
    %144 = vector.broadcast %cst_53 : f32 to vector<8x1xf32>
    %145 = arith.divf %143, %144 : vector<8x1xf32>
    %146 = vector.broadcast %145 : vector<8x1xf32> to vector<8x32xf32>
    %147 = arith.subf %139, %146 : vector<8x32xf32>
    %148 = arith.mulf %147, %147 : vector<8x32xf32>
    %cst_54 = arith.constant dense<0.000000e+00> : vector<8xf32>
    %149 = vector.multi_reduction <add>, %148, %cst_54 [1] : vector<8x32xf32> to vector<8xf32>
    %150 = vector.shape_cast %149 : vector<8xf32> to vector<8x1xf32>
    %cst_55 = arith.constant 3.200000e+01 : f32
    %151 = vector.broadcast %cst_55 : f32 to vector<8x1xf32>
    %152 = arith.divf %150, %151 : vector<8x1xf32>
    %153 = vector.broadcast %145 : vector<8x1xf32> to vector<8x32xf32>
    %154 = arith.subf %139, %153 : vector<8x32xf32>
    %cst_56 = arith.constant 9.99999974E-6 : f32
    %155 = vector.broadcast %cst_56 : f32 to vector<8x1xf32>
    %156 = arith.addf %152, %155 : vector<8x1xf32>
    %157 = math.rsqrt %156 : vector<8x1xf32>
    %158 = vector.broadcast %157 : vector<8x1xf32> to vector<8x32xf32>
    %159 = arith.mulf %154, %158 : vector<8x32xf32>
    %160 = vector.broadcast %140 : vector<1x32xf32> to vector<8x32xf32>
    %161 = arith.mulf %159, %160 : vector<8x32xf32>
    %162 = vector.broadcast %141 : vector<1x32xf32> to vector<8x32xf32>
    %163 = arith.addf %161, %162 : vector<8x32xf32>
    %164 = arith.truncf %163 : vector<8x32xf32> to vector<8x32xbf16>
    %c0_57 = arith.constant 0 : index
    %c0_58 = arith.constant 0 : index
    %165 = vector.load %arg10[%c0_57, %c0_58] : memref<32x128xbf16, #tpu.memory_space<vmem>>, vector<32x128xbf16>
    %cst_59 = arith.constant dense<0.000000e+00> : vector<8x128xf32>
    %166 = tpu.matmul %164, %165, %cst_59 {dimension_numbers = #tpu.dot_dimension_numbers<[1], [0], [0], [1], [0, 0, 1, 1], [], []>} : vector<8x32xbf16>, vector<32x128xbf16>, vector<8x128xf32> -> vector<8x128xf32>
    %c0_60 = arith.constant 0 : index
    %c0_61 = arith.constant 0 : index
    %167 = vector.load %arg11[%c0_60, %c0_61] : memref<1x128xf32, #tpu.memory_space<vmem>>, vector<1x128xf32>
    %168 = vector.broadcast %167 : vector<1x128xf32> to vector<8x128xf32>
    %169 = arith.addf %166, %168 : vector<8x128xf32>
    %cst_62 = arith.constant 5.000000e-01 : f32
    %170 = vector.broadcast %cst_62 : f32 to vector<8x128xf32>
    %171 = arith.mulf %170, %169 : vector<8x128xf32>
    %cst_63 = arith.constant 4.471500e-02 : f32
    %172 = vector.broadcast %cst_63 : f32 to vector<8x128xf32>
    %173 = arith.mulf %172, %169 : vector<8x128xf32>
    %174 = arith.mulf %173, %169 : vector<8x128xf32>
    %175 = arith.mulf %174, %169 : vector<8x128xf32>
    %176 = arith.addf %169, %175 : vector<8x128xf32>
    %cst_64 = arith.constant 0.797884583 : f32
    %177 = vector.broadcast %cst_64 : f32 to vector<8x128xf32>
    %178 = arith.mulf %177, %176 : vector<8x128xf32>
    %179 = math.tanh %178 : vector<8x128xf32>
    %cst_65 = arith.constant 1.000000e+00 : f32
    %180 = vector.broadcast %cst_65 : f32 to vector<8x128xf32>
    %181 = arith.addf %180, %179 : vector<8x128xf32>
    %182 = arith.mulf %171, %181 : vector<8x128xf32>
    %183 = arith.truncf %182 : vector<8x128xf32> to vector<8x128xbf16>
    %c0_66 = arith.constant 0 : index
    %c0_67 = arith.constant 0 : index
    %184 = vector.load %arg12[%c0_66, %c0_67] : memref<128x32xbf16, #tpu.memory_space<vmem>>, vector<128x32xbf16>
    %cst_68 = arith.constant dense<0.000000e+00> : vector<8x32xf32>
    %185 = tpu.matmul %183, %184, %cst_68 {dimension_numbers = #tpu.dot_dimension_numbers<[1], [0], [0], [1], [0, 0, 1, 1], [], []>} : vector<8x128xbf16>, vector<128x32xbf16>, vector<8x32xf32> -> vector<8x32xf32>
    %c0_69 = arith.constant 0 : index
    %c0_70 = arith.constant 0 : index
    %186 = vector.load %arg13[%c0_69, %c0_70] : memref<1x32xf32, #tpu.memory_space<vmem>>, vector<1x32xf32>
    %187 = vector.broadcast %186 : vector<1x32xf32> to vector<8x32xf32>
    %188 = arith.addf %185, %187 : vector<8x32xf32>
    %189 = arith.addf %139, %188 : vector<8x32xf32>
    %c0_71 = arith.constant 0 : index
    %c0_72 = arith.constant 0 : index
    %c0_73 = arith.constant 0 : index
    %190 = vector.load %arg14[%c0_71, %c0_72, %c0_73] : memref<1x8x32xf32, #tpu.memory_space<vmem>>, vector<1x8x32xf32>
    %191 = vector.shape_cast %190 : vector<1x8x32xf32> to vector<8x32xf32>
    %192 = vector.shape_cast %189 : vector<8x32xf32> to vector<1x8x32xf32>
    tpu.vector_store %arg14[%c0_71, %c0_72, %c0_73], %192 {strides = array<i32>} : memref<1x8x32xf32, #tpu.memory_space<vmem>>, vector<1x8x32xf32>,
    return
  }
  func.func @transform_0(%arg0: i32) -> (i32, i32, i32) {
    %c0_i32 = arith.constant 0 : i32
    %c0_i32_0 = arith.constant 0 : i32
    %c0_i32_1 = arith.constant 0 : i32
    return %arg0, %c0_i32, %c0_i32_0 : i32, i32, i32
  }
  func.func @transform_1(%arg0: i32) -> (i32, i32) {
    %c0_i32 = arith.constant 0 : i32
    %c0_i32_0 = arith.constant 0 : i32
    %c0_i32_1 = arith.constant 0 : i32
    return %c0_i32, %c0_i32_0 : i32, i32
  }
  func.func @transform_2(%arg0: i32) -> (i32, i32) {
    %c0_i32 = arith.constant 0 : i32
    %c0_i32_0 = arith.constant 0 : i32
    %c0_i32_1 = arith.constant 0 : i32
    return %c0_i32, %c0_i32_0 : i32, i32
  }
  func.func @transform_3(%arg0: i32) -> (i32, i32) {
    %c0_i32 = arith.constant 0 : i32
    %c0_i32_0 = arith.constant 0 : i32
    %c0_i32_1 = arith.constant 0 : i32
    return %c0_i32, %c0_i32_0 : i32, i32
  }
  func.func @transform_4(%arg0: i32) -> (i32, i32) {
    %c0_i32 = arith.constant 0 : i32
    %c0_i32_0 = arith.constant 0 : i32
    %c0_i32_1 = arith.constant 0 : i32
    return %c0_i32, %c0_i32_0 : i32, i32
  }
  func.func @transform_5(%arg0: i32) -> (i32, i32) {
    %c0_i32 = arith.constant 0 : i32
    %c0_i32_0 = arith.constant 0 : i32
    %c0_i32_1 = arith.constant 0 : i32
    return %c0_i32, %c0_i32_0 : i32, i32
  }
  func.func @transform_6(%arg0: i32) -> (i32, i32) {
    %c0_i32 = arith.constant 0 : i32
    %c0_i32_0 = arith.constant 0 : i32
    %c0_i32_1 = arith.constant 0 : i32
    return %c0_i32, %c0_i32_0 : i32, i32
  }
  func.func @transform_7(%arg0: i32) -> (i32, i32) {
    %c0_i32 = arith.constant 0 : i32
    %c0_i32_0 = arith.constant 0 : i32
    %c0_i32_1 = arith.constant 0 : i32
    return %c0_i32, %c0_i32_0 : i32, i32
  }
  func.func @transform_8(%arg0: i32) -> (i32, i32) {
    %c0_i32 = arith.constant 0 : i32
    %c0_i32_0 = arith.constant 0 : i32
    %c0_i32_1 = arith.constant 0 : i32
    return %c0_i32, %c0_i32_0 : i32, i32
  }
  func.func @transform_9(%arg0: i32) -> (i32, i32) {
    %c0_i32 = arith.constant 0 : i32
    %c0_i32_0 = arith.constant 0 : i32
    %c0_i32_1 = arith.constant 0 : i32
    return %c0_i32, %c0_i32_0 : i32, i32
  }
  func.func @transform_10(%arg0: i32) -> (i32, i32) {
    %c0_i32 = arith.constant 0 : i32
    %c0_i32_0 = arith.constant 0 : i32
    %c0_i32_1 = arith.constant 0 : i32
    return %c0_i32, %c0_i32_0 : i32, i32
  }
  func.func @transform_11(%arg0: i32) -> (i32, i32) {
    %c0_i32 = arith.constant 0 : i32
    %c0_i32_0 = arith.constant 0 : i32
    %c0_i32_1 = arith.constant 0 : i32
    return %c0_i32, %c0_i32_0 : i32, i32
  }
  func.func @transform_12(%arg0: i32) -> (i32, i32) {
    %c0_i32 = arith.constant 0 : i32
    %c0_i32_0 = arith.constant 0 : i32
    %c0_i32_1 = arith.constant 0 : i32
    return %c0_i32, %c0_i32_0 : i32, i32
  }
  func.func @transform_13(%arg0: i32) -> (i32, i32, i32) {
    %c0_i32 = arith.constant 0 : i32
    %c0_i32_0 = arith.constant 0 : i32
    %c0_i32_1 = arith.constant 0 : i32
    return %arg0, %c0_i32, %c0_i32_0 : i32, i32, i32
  }
}

</mosaic_0001>

<bundles_post_ra>
// kernel: tpu_custom_call.1
= control target key start
LH: loop header
LB: loop body
LE: loop exit
PB: predicated region body
PF: predicated region fallthrough
CT: control target
= control target key end

     0   :  { %s2047_s0 = inlined_call_operand.vmem [shape: f32[2,8,32], index: 0, kind: input, shape index: {}]   ;;  %s2048_s1 = inlined_call_operand.vmem [shape: f32[1,32], index: 1, kind: input, shape index: {}]   ;;  %s2049_s2 = inlined_call_operand.vmem [shape: f32[1,32], index: 2, kind: input, shape index: {}]   ;;  %s2050_s3 = inlined_call_operand.vmem [shape: bf16[32,96], index: 3, kind: input, shape index: {}]   ;;  %s2051_s4 = inlined_call_operand.vmem [shape: f32[1,96], index: 4, kind: input, shape index: {}]   ;;  %s2052_s5 = inlined_call_operand.vmem [shape: bf16[32,32], index: 5, kind: input, shape index: {}]   ;;  %s2053_s6 = inlined_call_operand.vmem [shape: f32[1,32], index: 6, kind: input, shape index: {}]   ;;  %s2054_s7 = inlined_call_operand.vmem [shape: f32[1,32], index: 7, kind: input, shape index: {}]   ;;  %s2055_s8 = inlined_call_operand.vmem [shape: f32[1,32], index: 8, kind: input, shape index: {}]   ;;  %s2056_s9 = inlined_call_operand.vmem [shape: bf16[32,128], index: 9, kind: input, shape index: {}]   ;;  %s2057_s10 = inlined_call_operand.vmem [shape: f32[1,128], index: 10, kind: input, shape index: {}]   ;;  %s2058_s11 = inlined_call_operand.vmem [shape: bf16[128,32], index: 11, kind: input, shape index: {}]   ;;  %s2059_s12 = inlined_call_operand.vmem [shape: f32[1,32], index: 12, kind: input, shape index: {}]   ;;  %s2060_s13 = inlined_call_operand.hbm [shape: f32[2,8,32], index: 13, kind: output, shape index: {}]  }
   0x1   :  { %2061 = sst [smem:[#allocation6_spill]] %s2047_s0 }
   0x2   :  { %2062 = sst [smem:[#allocation7_spill]] %s2048_s1 }
   0x3   :  { %2063 = sst [smem:[#allocation8_spill]] %s2049_s2 }
   0x4   :  { %18 = vsyncpa [#allocation4], 0 }
   0x5   :  { %20 = vsyncpa [#allocation4 + $0x1], 0  ;;  %s1779_s25 = smov 0   ;;  %s1781_s26 = smov 0  }
   0x6   :  { %s1783_s27 = smov 0   ;;  %s1785_s28 = smov 0  }
   0x7 LB: > { %s1800_s29 = sadd.s32 4294967295, %s1690_s28   ;;  %s1370_s30 = sadd.s32 4294967294, %s1690_s28   ;;  %s1690_s28 = sphi %s1785_s28, %s2072_s28   ;;  %s1686_s27 = sphi %s1783_s27, %s2071_s27   ;;  %s1682_s26 = sphi %s1781_s26, %s2070_s26   ;;  %s1678_s25 = sphi %s1779_s25, %s2069_s25  }
   0x8   : > { %s1804_s14 = sadd.s32 1, %s1690_s28   ;;  %s311_s15 = sadd.s32 1, %s1686_s27 }
   0x9   : > { %s308_s16 = ssub.s32 %s1690_s28, %s1804_s14  ;;  %p321_p0 = scmp.ne.s32.totalorder %s1686_s27, %s1682_s26 }
   0xa   : > { %p309_p1 = scmp.eq.s32.totalorder %s308_s16, 0  ;;  %p322_p2 = scmp.eq.s32.totalorder %s1800_s29, 1 }
   0xb   : > { %p327_p3 = scmp.ne.s32.totalorder %s1682_s26, %s1678_s25  ;;  %p328_p4 = scmp.eq.s32.totalorder %s1370_s30, 1 }
   0xc   : > { %s1815_s17 = scalar_select %p309_p1, %s1686_s27, %s311_s15  }
   0xd   : > { %p1817_p5 = por %p322_p2, %p321_p0  ;;  %p1821_p6 = por %p328_p4, %p327_p3 }
   0xe   : > { %p1373_p7 = scmp.ge.s32.totalorder %s1690_s28, 1  ;;  %p389_p8 = scmp.lt.s32.totalorder %s1690_s28, 3 }
  0x10   : > { %p390_p9 = pnand %p1373_p7, %p389_p8 }
  0x11   : > { %p432_p10 = scmp.lt.s32.totalorder (!%p390_p9), %s1800_s29, 1  ;;  %s2066_s0 = sld [smem:[#allocation6_spill]] (!%p390_p9) }
  0x12   : > { %393 = sbr.rel (%p390_p9) target bundleno = 2488 (0x9b8), region = 72  ;;  %s2067_s1 = sld [smem:[#allocation7_spill]] (!%p390_p9) }
  0x13   : > { %s2068_s2 = sld [smem:[#allocation8_spill]] (!%p390_p9)  ;;  %s1694_s16 = smov (!%p390_p9), 96  }
  0x14   : > { %s1697_s22 = smov (!%p390_p9), 80   ;;  %s1698_s23 = smov (!%p390_p9), 112  }
  0x15   : > { %s1700_s30 = smov (!%p390_p9), 104   ;;  %s1701_s15 = smov (!%p390_p9), 64  }
  0x17   : > { %s433_s20 = scalar_select %p432_p10, %s1800_s29, 1  ;;  %vm440_vm0 = vcmask 261120   ;;  %v1594_v7 = vld [vmem:[%s2050_s3 + $0x8] sm:$0xff]   ;;  %v1692_v8 = vmov 0.0   ;;  %vm1693_vm1 = vmmov 0   ;;  %v1595_v9 = vld [vmem:[%s2050_s3] sm:$0xff]   ;;  %v537_v40 = vlaneseq }
  0x18   : > { %1447 = vmatprep.subr.bf16.mxu0 %v1692_v8  ;;  %1451 = vmatprep.mubr.msk.bf16.mxu0 %vm1693_vm1, %v1692_v8  ;;  %v1376_v14 = vld [vmem:[%s2067_s1] ss:$0 sm:$0xff]  ;;  %vm547_vm2 = vcmask 64512   ;;  %vm612_vm4 = vcmask 1043456   ;;  %vm773_vm5 = vcmask 130112   ;;  %vm890_vm6 = vcmask 195712  }
  0x19   : > { %s1375_s21 = sshll.u32 %s433_s20, 3  ;;  %1448 = vmatpush3.bf16.msra.mxu0 %v1594_v7  ;;  %1467 = vmatprep.subr.bf16.mxu1 %v1692_v8  ;;  %v1377_v16 = vld [vmem:[%s2068_s2] ss:$0 sm:$0xff]  ;;  %s1695_s20 = smov 120   ;;  %v538_v41 = vshrl.u32 %v537_v40, 7  ;;  %v540_v42 = vand.u32 127, %v537_v40 }
  0x1a   : > { %s435_s24 = scalar_lea.vmem %s2066_s0, %s1375_s21  ;;  %1449 = vmatprep.subr.bf16.mxu0 %v1692_v8  ;;  %1469 = vmatprep.mubr.msk.bf16.mxu1 %vm1693_vm1, %v1692_v8  ;;  %v1378_v20 = vld [vmem:[%s2051_s4] ss:$0 sm:$0xff]  ;;  %s1696_s21 = smov 88   ;;  %vm1007_vm7 = vcmask 261312  }
  0x1b   : > { %v1832_v0 = vld [vmem:[%s435_s24] sm:$0xff]  ;;  %s1699_s24 = smov 72   ;;  %vm541_vm3 = vcmp.le.s32.totalorder %v540_v42, %v538_v41 }
  0x1c   : > { %v441_v1 = vsel %vm440_vm0, %v1832_v0, 0.0 }
  0x1d   : > { %442 = vadd.xlane.f32.xlu0 %v441_v1  ;;  %1450 = vmatpush3.bf16.msra.mxu0 %v1595_v9 }
  0x1e   : > { %1455 = vmatprep.subr.bf16.mxu0 %v1692_v8 }
  0xa6   : > { %v443_v2 = vpop.xlane.xlu0 %442 }
  0xa7   : > { %v445_v3 = vmul.f32 0.03125, %v443_v2 }
  0xa9   : > { %v446_v4 = vsub.f32 %v1832_v0, %v445_v3 }
  0xab   : > { %v447_v5 = vmul.f32 %v446_v4, %v446_v4 }
  0xad   : > { %v448_v6 = vsel %vm440_vm0, %v447_v5, 0.0 }
  0xae   : > { %449 = vadd.xlane.f32.xlu0 %v448_v6 }
 0x137   : > { %v450_v10 = vpop.xlane.xlu0 %449 }
 0x138   : > { %v451_v11 = vmul.f32 0.03125, %v450_v10 }
 0x13a   : > { %v452_v12 = vadd.f32 1e-05, %v451_v11 }
 0x13c   : > { %1608 = vrsqrt.f32 %v452_v12 }
 0x149   : > { %v1609_v13 = vpop.eup %1608 }
 0x14a   : > { %v454_v15 = vmul.f32 %v1609_v13, %v446_v4 }
 0x14c   : > { %v461_v17 = vmul.f32 %v1376_v14, %v454_v15 }
 0x14e   : > { %v468_v18 = vadd.f32 %v1377_v16, %v461_v17 }
 0x150   : > { %v469_v19 = vpack.c.bf16 %v468_v18, %v468_v18 }
 0x152   : > { %1452 = vmatmul.mubr.msk.bf16.vlgmr.msra.gmra.mxu0 %vm440_vm0, %v469_v19 }
 0x153   : > { %1457 = vmatprep.mubr.msk.bf16.mxu0 %vm1693_vm1, %v1692_v8 }
 0x212   : > { %v530_v21 = vpop.f32.mrf.mxu0 }
 0x213   : > { %v531_v22 = vadd.f32 %v1378_v20, %v530_v21 }
 0x214   : > { %v1453_v23 = vpop.f32.mrf.mxu0 }
 0x215   : > { %v536_v24 = vmul.f32 0.35355338, %v531_v22  ;;  %v1864_v25 = vpack.c.bf16 %v531_v22, %v531_v22 }
 0x216   : > { %v533_v26 = vpop.f32.mrf.mxu0 }
 0x217   : > { %v542_v27 = vpack.c.bf16 %v536_v24, %v536_v24  ;;  %545 = vrot.lane.b32.xlu1 %v1864_v25, %s1694_s16  ;;  %s1702_s16 = smov 56  }
 0x218   : > { %v1454_v28 = vpop.f32.mrf.mxu0 }
 0x219   : > { %658 = vrot.lane.b32.xlu0 %v542_v27, %s1695_s20  ;;  %s1703_s20 = smov 48  }
 0x21b   : > { %660 = vrot.lane.b32.xlu1 %v1864_v25, %s1696_s21  ;;  %s1704_s21 = smov 40  }
 0x21f   : > { %777 = vrot.lane.b32.xlu1 %v1864_v25, %s1697_s22  ;;  %s1705_s22 = smov 8  }
 0x223   : > { %775 = vrot.lane.b32.xlu1 %v542_v27, %s1698_s23 }
 0x227   : > { %894 = vrot.lane.b32.xlu1 %v1864_v25, %s1699_s24 }
 0x22b   : > { %892 = vrot.lane.b32.xlu1 %v542_v27, %s1700_s30  ;;  %s429_s30 = sand.u32 1, %s1682_s26  }
 0x289   : > { %v546_v29 = vpop.permute.xlu1 %545 }
 0x28a   : > { %v552_v30 = vsel %vm547_vm2, %v546_v29, 0 }
 0x28b   : > { %1456 = vmatpush3.bf16.xpose.msra.mxu0 %v552_v30  ;;  %v659_v34 = vpop.permute.xlu0 %658 }
 0x28c   : > { %1461 = vmatprep.subr.bf16.mxu0 %v1692_v8 }
 0x28d   : > { %v661_v31 = vpop.permute.xlu1 %660 }
 0x28e   : > { %v666_v32 = vsel %vm547_vm2, %v661_v31, 0 }
 0x28f   : > { %1468 = vmatpush3.bf16.xpose.msra.mxu1 %v666_v32 }
 0x290   : > { %1479 = vmatprep.subr.bf16.mxu1 %v1692_v8 }
 0x291   : > { %v778_v33 = vpop.permute.xlu1 %777 }
 0x292   : > { %1458 = vmatmul.mubr.msk.bf16.vlgmr.msra.gmra.mxu0 %vm547_vm2, %v542_v27  ;;  %v783_v36 = vsel %vm547_vm2, %v778_v33, 0 }
 0x293   : > { %1463 = vmatprep.mubr.msk.bf16.mxu0 %vm1693_vm1, %v1692_v8 }
 0x295   : > { %v776_v35 = vpop.permute.xlu1 %775 }
 0x296   : > { %1470 = vmatmul.mubr.msk.bf16.vlgmr.msra.gmra.mxu1 %vm547_vm2, %v659_v34 }
 0x297   : > { %1480 = vmatpush3.bf16.xpose.msra.mxu1 %v783_v36  ;;  %1481 = vmatprep.mubr.msk.bf16.mxu1 %vm1693_vm1, %v1692_v8 }
 0x298   : > { %1491 = vmatprep.subr.bf16.mxu1 %v1692_v8 }
 0x299   : > { %v895_v37 = vpop.permute.xlu1 %894 }
 0x29a   : > { %v900_v38 = vsel %vm547_vm2, %v895_v37, 0 }
 0x29d   : > { %v893_v39 = vpop.permute.xlu1 %892 }
 0x29e   : > { %1482 = vmatmul.mubr.msk.bf16.vlgmr.msra.gmra.mxu1 %vm547_vm2, %v776_v35 }
 0x29f   : > { %1492 = vmatpush3.bf16.xpose.msra.mxu1 %v900_v38  ;;  %1493 = vmatprep.mubr.msk.bf16.mxu1 %vm1693_vm1, %v1692_v8 }
 0x2a0   : > { %1503 = vmatprep.subr.bf16.mxu1 %v1692_v8 }
 0x2a6   : > { %1494 = vmatmul.mubr.msk.bf16.vlgmr.msra.gmra.mxu1 %vm547_vm2, %v893_v39 }
 0x2a7   : > { %1507 = vmatprep.mubr.msk.bf16.mxu1 %vm1693_vm1, %v1692_v8 }
 0x352   : > { %v588_v43 = vpop.f32.mrf.mxu0 }
 0x353   : > { %v594_v44 = vsel %vm541_vm3, %v588_v43, -inf }
 0x354   : > { %v1459_v45 = vpop.f32.mrf.mxu0  ;;  %v595_v46 = vsel %vm547_vm2, %v594_v44, -inf }
 0x355   : > { %596 = vmax.xlane.f32.xlu1 %v595_v46 }
 0x356   : > { %v591_v47 = vpop.f32.mrf.mxu0  ;;  %v702_v48 = vpop.f32.mrf.mxu1 }
 0x357   : > { %v708_v49 = vsel %vm541_vm3, %v702_v48, -inf }
 0x358   : > { %v1460_v50 = vpop.f32.mrf.mxu0  ;;  %v1471_v51 = vpop.f32.mrf.mxu1  ;;  %v709_v52 = vsel %vm547_vm2, %v708_v49, -inf }
 0x359   : > { %710 = vmax.xlane.f32.xlu0 %v709_v52 }
 0x35a   : > { %v705_v53 = vpop.f32.mrf.mxu1 }
 0x35c   : > { %v1472_v54 = vpop.f32.mrf.mxu1 }
 0x35e   : > { %v819_v55 = vpop.f32.mrf.mxu1 }
 0x35f   : > { %v825_v56 = vsel %vm541_vm3, %v819_v55, -inf }
 0x360   : > { %v1483_v57 = vpop.f32.mrf.mxu1  ;;  %v826_v58 = vsel %vm547_vm2, %v825_v56, -inf }
 0x361   : > { %827 = vmax.xlane.f32.xlu1 %v826_v58  ;;  %v1596_v57 = vld [vmem:[%s2052_s5 + $0x8] sm:$0xff]   ;;  %v1597_v58 = vld [vmem:[%s2052_s5] sm:$0xff]  }
 0x362   : > { %v822_v59 = vpop.f32.mrf.mxu1  ;;  %1504 = vmatpush3.bf16.msra.mxu1 %v1596_v57  ;;  %v1400_v57 = vld [vmem:[%s2059_s12] ss:$0 sm:$0xff] }
 0x363   : > { %1505 = vmatprep.subr.bf16.mxu1 %v1692_v8 }
 0x364   : > { %v1484_v60 = vpop.f32.mrf.mxu1 }
 0x366   : > { %v936_v61 = vpop.f32.mrf.mxu1  ;;  %1506 = vmatpush3.bf16.msra.mxu1 %v1597_v58 }
 0x367   : > { %v942_v62 = vsel %vm541_vm3, %v936_v61, -inf  ;;  %1519 = vmatprep.subr.bf16.mxu1 %v1692_v8 }
 0x368   : > { %v1495_v63 = vpop.f32.mrf.mxu1  ;;  %v943_v1 = vsel %vm547_vm2, %v942_v62, -inf }
 0x369   : > { %944 = vmax.xlane.f32.xlu0 %v943_v1 }
 0x36a   : > { %v939_v2 = vpop.f32.mrf.mxu1 }
 0x36c   : > { %v1496_v3 = vpop.f32.mrf.mxu1 }
 0x3de   : > { %v597_v4 = vpop.xlane.xlu1 %596 }
 0x3df   : > { %v598_v5 = vsub.f32 %v594_v44, %v597_v4 }
 0x3e1   : > { %v599_v6 = vmul.f32 1.442695, %v598_v5 }
 0x3e2   : > { %v711_v7 = vpop.xlane.xlu0 %710 }
 0x3e3   : > { %1610 = vpow2.f32 %v599_v6  ;;  %v712_v9 = vsub.f32 %v708_v49, %v711_v7 }
 0x3e5   : > { %v713_v10 = vmul.f32 1.442695, %v712_v9 }
 0x3e7   : > { %1612 = vpow2.f32 %v713_v10  ;;  %v1390_v10 = vld [vmem:[%s2053_s6] ss:$0 sm:$0xff] }
 0x3ea   : > { %v828_v20 = vpop.xlane.xlu1 %827 }
 0x3eb   : > { %v829_v21 = vsub.f32 %v825_v56, %v828_v20 }
 0x3ed   : > { %v830_v22 = vmul.f32 1.442695, %v829_v21 }
 0x3f0   : > { %v1611_v11 = vpop.eup %1610 }
 0x3f1   : > { %v601_v12 = vsel %vm547_vm2, %v1611_v11, 0.0 }
 0x3f2   : > { %v945_v13 = vpop.xlane.xlu0 %944  ;;  %602 = vadd.xlane.f32.xlu1 %v601_v12 }
 0x3f3   : > { %v946_v14 = vsub.f32 %v942_v62, %v945_v13 }
 0x3f4   : > { %v1613_v15 = vpop.eup %1612 }
 0x3f5   : > { %v947_v16 = vmul.f32 1.442695, %v946_v14  ;;  %v715_v17 = vsel %vm547_vm2, %v1613_v15, 0.0 }
 0x3f6   : > { %716 = vadd.xlane.f32.xlu0 %v715_v17 }
 0x3f7   : > { %1614 = vpow2.f32 %v947_v16 }
 0x3f8   : > { %1616 = vpow2.f32 %v830_v22 }
 0x403   : > { %607 = vrot.lane.b32.xlu1 %v1864_v25, %s1701_s15  ;;  %s1374_s15 = sshll.u32 %s429_s30, 3 }
 0x404   : > { %v1615_v18 = vpop.eup %1614 }
 0x405   : > { %v949_v19 = vsel %vm547_vm2, %v1615_v18, 0.0  ;;  %v1617_v23 = vpop.eup %1616 }
 0x406   : > { %950 = vadd.xlane.f32.xlu0 %v949_v19  ;;  %v832_v24 = vsel %vm547_vm2, %v1617_v23, 0.0 }
 0x41c   : > { %721 = vrot.lane.b32.xlu0 %v1864_v25, %s1702_s16  ;;  %s1706_s16 = smov 16  }
 0x427   : > { %833 = vadd.xlane.f32.xlu1 %v832_v24 }
 0x438   : > { %838 = vrot.lane.b32.xlu1 %v1864_v25, %s1703_s20  ;;  %s1707_s20 = smov 24  }
 0x43c   : > { %955 = vrot.lane.b32.xlu1 %v1864_v25, %s1704_s21  ;;  %s1410_s21 = sshll.u32 %s1800_s29, 7  ;;  %s1298_s29 = scalar_lea.sflag [#allocation4], %s429_s30 }
 0x43d   : > { %s2005_s1 = scalar_lea.hbm %s2060_s13, %s1410_s21 }
 0x47b   : > { %v603_v26 = vpop.xlane.xlu1 %602 }
 0x47c   : > { %1618 = vrcp.f32 %v603_v26 }
 0x47f   : > { %v717_v27 = vpop.xlane.xlu0 %716  ;;  %v608_v28 = vpop.permute.xlu1 %607 }
 0x480   : > { %v614_v29 = vsel %vm612_vm4, %v608_v28, 0  ;;  %1620 = vrcp.f32 %v717_v27 }
 0x481   : > { %1462 = vmatpush3.bf16.msra.mxu0 %v614_v29  ;;  %v1394_v29 = vld [vmem:[%s2054_s7] ss:$0 sm:$0xff] }
 0x482   : > { %1473 = vmatprep.subr.bf16.mxu0 %v1692_v8 }
 0x489   : > { %v1619_v30 = vpop.eup %1618 }
 0x48a   : > { %v605_v31 = vmul.f32 %v1619_v30, %v1611_v11 }
 0x48c   : > { %v606_v32 = vpack.c.bf16 %v605_v31, %v605_v31  ;;  %v1395_v31 = vld [vmem:[%s2055_s8] ss:$0 sm:$0xff] }
 0x48d   : > { %v1621_v33 = vpop.eup %1620 }
 0x48e   : > { %1464 = vmatmul.mubr.msk.bf16.vlgmr.msra.gmra.mxu0 %vm547_vm2, %v606_v32  ;;  %v719_v25 = vmul.f32 %v1621_v33, %v1613_v15 }
 0x48f   : > { %v951_v34 = vpop.xlane.xlu0 %950  ;;  %1475 = vmatprep.mubr.msk.bf16.mxu0 %vm1693_vm1, %v1692_v8 }
 0x490   : > { %v720_v37 = vpack.c.bf16 %v719_v25, %v719_v25  ;;  %v1600_v25 = vld [vmem:[%s2058_s11 + $0x38] sm:$0xff]  }
 0x493   : > { %v722_v35 = vpop.permute.xlu0 %721 }
 0x494   : > { %v727_v36 = vsel %vm612_vm4, %v722_v35, 0  ;;  %v1601_v35 = vld [vmem:[%s2058_s11 + $0x30] sm:$0xff]  }
 0x495   : > { %1474 = vmatpush3.bf16.msra.mxu0 %v727_v36  ;;  %v1602_v36 = vld [vmem:[%s2058_s11 + $0x28] sm:$0xff]  }
 0x496   : > { %1485 = vmatprep.subr.bf16.mxu0 %v1692_v8 }
 0x498   : > { %1476 = vmatmul.mubr.msk.bf16.vlgmr.msra.gmra.mxu0 %vm547_vm2, %v720_v37  ;;  %v1603_v37 = vld [vmem:[%s2058_s11 + $0x20] sm:$0xff]  }
 0x499   : > { %1487 = vmatprep.mubr.msk.bf16.mxu0 %vm1693_vm1, %v1692_v8 }
 0x4b0   : > { %v834_v38 = vpop.xlane.xlu1 %833 }
 0x4b1   : > { %1622 = vrcp.f32 %v834_v38  ;;  %v1604_v38 = vld [vmem:[%s2058_s11 + $0x18] sm:$0xff]  }
 0x4b2   : > { %1624 = vrcp.f32 %v951_v34 }
 0x4b4   : > { %v839_v39 = vpop.permute.xlu1 %838 }
 0x4b5   : > { %v844_v40 = vsel %vm612_vm4, %v839_v39, 0  ;;  %v1605_v39 = vld [vmem:[%s2058_s11 + $0x10] sm:$0xff]  }
 0x4b6   : > { %1486 = vmatpush3.bf16.msra.mxu0 %v844_v40  ;;  %v1606_v40 = vld [vmem:[%s2058_s11 + $0x8] sm:$0xff]  }
 0x4b7   : > { %1497 = vmatprep.subr.bf16.mxu0 %v1692_v8 }
 0x4b8   : > { %v956_v43 = vpop.permute.xlu1 %955 }
 0x4b9   : > { %v961_v46 = vsel %vm612_vm4, %v956_v43, 0 }
 0x4be   : > { %v1623_v41 = vpop.eup %1622 }
 0x4bf   : > { %v836_v42 = vmul.f32 %v1623_v41, %v1617_v23  ;;  %v1625_v45 = vpop.eup %1624  ;;  %v1598_v23 = vld [vmem:[%s2056_s9 + $0x8] sm:$0xff]   ;;  %v1607_v41 = vld [vmem:[%s2058_s11] sm:$0xff]  }
 0x4c0   : > { %v953_v47 = vmul.f32 %v1625_v45, %v1615_v18 }
 0x4c1   : > { %v837_v44 = vpack.c.bf16 %v836_v42, %v836_v42  ;;  %v1396_v42 = vld [vmem:[%s2057_s10] ss:$0 sm:$0xff] }
 0x4c2   : > { %v954_v48 = vpack.c.bf16 %v953_v47, %v953_v47 }
 0x4c3   : > { %1488 = vmatmul.mubr.msk.bf16.vlgmr.msra.gmra.mxu0 %vm547_vm2, %v837_v44 }
 0x4c4   : > { %1498 = vmatpush3.bf16.msra.mxu0 %v961_v46  ;;  %1499 = vmatprep.mubr.msk.bf16.mxu0 %vm1693_vm1, %v1692_v8 }
 0x4c5   : > { %1511 = vmatprep.subr.bf16.mxu0 %v1692_v8 }
 0x4cb   : > { %1500 = vmatmul.mubr.msk.bf16.vlgmr.msra.gmra.mxu0 %vm547_vm2, %v954_v48 }
 0x4cc   : > { %1515 = vmatprep.mubr.msk.bf16.mxu0 %vm1693_vm1, %v1692_v8  ;;  %1512 = vmatpush3.bf16.msra.mxu0 %v1598_v23 }
 0x4cd   : > { %1513 = vmatprep.subr.bf16.mxu0 %v1692_v8 }
 0x54e   : > { %v650_v49 = vpop.f32.mrf.mxu0 }
 0x54f   : > { %656 = vst.msk [vmem:[#allocation2] sm:$0xff] %vm547_vm2, %v650_v49 }
 0x550   : > { %v1465_v50 = vpop.f32.mrf.mxu0 }
 0x552   : > { %v653_v51 = vpop.f32.mrf.mxu0 }
 0x554   : > { %v1466_v52 = vpop.f32.mrf.mxu0 }
 0x558   : > { %v763_v53 = vpop.f32.mrf.mxu0 }
 0x559   : > { %770 = vrot.lane.b32.xlu0 %v763_v53, %s1705_s22  ;;  %s431_s22 = scalar_lea.vmem [#allocation3], %s1374_s15 }
 0x55a   : > { %v1477_v54 = vpop.f32.mrf.mxu0  ;;  %s1311_s23 = sshll.u32 %s431_s22, 4  ;;  %s2007_s23 = int_to_ptr.vmem [resolvable:$true] %s1311_s23 }
 0x55b   : > { %s1630_s15 = scalar_lea.vmem %s2007_s23, 128 }
 0x55c   : > { %v766_v55 = vpop.f32.mrf.mxu0  ;;  %p1631_p11 = scmp.ne.s32.totalorder %s2007_s23, %s1630_s15 }
 0x55e   : > { %v1478_v56 = vpop.f32.mrf.mxu0  ;;  %p1632_p12 = pnand %p1631_p11, %p1817_p5 }
 0x560   : > { %p1633_p13 = pneg %p1632_p12 }
 0x583   : > { %v880_v59 = vpop.f32.mrf.mxu0 }
 0x584   : > { %887 = vrot.lane.b32.xlu1 %v880_v59, %s1706_s16  ;;  %s1708_s16 = smov [#allocation3]  }
 0x585   : > { %v1489_v60 = vpop.f32.mrf.mxu0 }
 0x587   : > { %v883_v61 = vpop.f32.mrf.mxu0 }
 0x589   : > { %v1490_v62 = vpop.f32.mrf.mxu0 }
 0x58b   : > { %v997_v63 = vpop.f32.mrf.mxu0 }
 0x58c   : > { %1004 = vrot.lane.b32.xlu0 %v997_v63, %s1707_s20  ;;  %s1634_s20 = sshll.u32 %s1708_s16, 4  ;;  %s1635_s20 = int_to_ptr.vmem [resolvable:$false] %s1634_s20 }
 0x58d   : > { %v1501_v1 = vpop.f32.mrf.mxu0  ;;  %s1636_s0 = scalar_lea.vmem %s1635_s20, 256  ;;  %p1637_p0 = scmp.lt.s32.totalorder %s2007_s23, %s1635_s20 }
 0x58e   : > { %p1638_p1 = scmp.lt.s32.totalorder %s1636_s0, %s1630_s15 }
 0x58f   : > { %v1000_v2 = vpop.f32.mrf.mxu0 }
 0x590   : > { %p1639_p2 = por %p1638_p1, %p1637_p0 }
 0x591   : > { %v1502_v3 = vpop.f32.mrf.mxu0 }
 0x592   : > { %p1640_p3 = pnand %p1639_p2, %p1633_p13 }
 0x5cb   : > { %v771_v4 = vpop.permute.xlu0 %770 }
 0x5cc   : > { %774 = vst.msk [vmem:[#allocation2] sm:$0xff] %vm773_vm5, %v771_v4 }
 0x5f6   : > { %v888_v5 = vpop.permute.xlu1 %887 }
 0x5f7   : > { %891 = vst.msk [vmem:[#allocation2] sm:$0xff] %vm890_vm6, %v888_v5 }
 0x5fe   : > { %v1005_v6 = vpop.permute.xlu0 %1004 }
 0x5ff   : > { %1008 = vst.msk [vmem:[#allocation2] sm:$0xff] %vm1007_vm7, %v1005_v6 }
 0x606   : > { %v1009_v7 = vld [vmem:[#allocation2] sm:$0xff] }
 0x607   : > { %v1010_v9 = vpack.c.bf16 %v1009_v7, %v1009_v7 }
 0x609   : > { %1508 = vmatmul.mubr.msk.bf16.vlgmr.msra.gmra.mxu1 %vm440_vm0, %v1010_v9 }
 0x60a   : > { %1535 = vmatprep.mubr.msk.bf16.mxu1 %vm1693_vm1, %v1692_v8  ;;  %1520 = vmatpush3.bf16.msra.mxu1 %v1600_v25 }
 0x60b   : > { %1521 = vmatprep.subr.bf16.mxu1 %v1692_v8 }
 0x60e   : > { %1522 = vmatpush3.bf16.msra.mxu1 %v1601_v35 }
 0x60f   : > { %1523 = vmatprep.subr.bf16.mxu1 %v1692_v8 }
 0x612   : > { %1524 = vmatpush3.bf16.msra.mxu1 %v1602_v36 }
 0x613   : > { %1525 = vmatprep.subr.bf16.mxu1 %v1692_v8 }
 0x616   : > { %1526 = vmatpush3.bf16.msra.mxu1 %v1603_v37 }
 0x617   : > { %1527 = vmatprep.subr.bf16.mxu1 %v1692_v8 }
 0x61a   : > { %1528 = vmatpush3.bf16.msra.mxu1 %v1604_v38 }
 0x61b   : > { %1529 = vmatprep.subr.bf16.mxu1 %v1692_v8 }
 0x61e   : > { %1530 = vmatpush3.bf16.msra.mxu1 %v1605_v39 }
 0x61f   : > { %1531 = vmatprep.subr.bf16.mxu1 %v1692_v8 }
 0x622   : > { %1532 = vmatpush3.bf16.msra.mxu1 %v1606_v40 }
 0x623   : > { %1533 = vmatprep.subr.bf16.mxu1 %v1692_v8 }
 0x626   : > { %1534 = vmatpush3.bf16.msra.mxu1 %v1607_v41 }
 0x6c9   : > { %v1071_v11 = vpop.f32.mrf.mxu1 }
 0x6ca   : > { %v1072_v12 = vadd.f32 %v1390_v10, %v1071_v11 }
 0x6cb   : > { %v1509_v13 = vpop.f32.mrf.mxu1 }
 0x6cc   : > { %v1942_v14 = vadd.f32 %v1072_v12, %v1832_v0  ;;  %v1599_v0 = vld [vmem:[%s2056_s9] sm:$0xff]  }
 0x6cd   : > { %v1074_v15 = vpop.f32.mrf.mxu1  ;;  %1514 = vmatpush3.bf16.msra.mxu0 %v1599_v0 }
 0x6ce   : > { %v1080_v16 = vsel %vm440_vm0, %v1942_v14, 0.0 }
 0x6cf   : > { %1081 = vadd.xlane.f32.xlu1 %v1080_v16  ;;  %v1510_v17 = vpop.f32.mrf.mxu1 }
 0x758   : > { %v1082_v18 = vpop.xlane.xlu1 %1081 }
 0x759   : > { %v1083_v19 = vmul.f32 0.03125, %v1082_v18 }
 0x75b   : > { %v1084_v20 = vsub.f32 %v1942_v14, %v1083_v19 }
 0x75d   : > { %v1085_v21 = vmul.f32 %v1084_v20, %v1084_v20 }
 0x75f   : > { %v1086_v22 = vsel %vm440_vm0, %v1085_v21, 0.0 }
 0x760   : > { %1087 = vadd.xlane.f32.xlu0 %v1086_v22 }
 0x7e9   : > { %v1088_v24 = vpop.xlane.xlu0 %1087 }
 0x7ea   : > { %v1089_v26 = vmul.f32 0.03125, %v1088_v24 }
 0x7ec   : > { %v1090_v27 = vadd.f32 1e-05, %v1089_v26 }
 0x7ee   : > { %1626 = vrsqrt.f32 %v1090_v27 }
 0x7fb   : > { %v1627_v28 = vpop.eup %1626 }
 0x7fc   : > { %v1092_v30 = vmul.f32 %v1627_v28, %v1084_v20 }
 0x7fe   : > { %v1099_v32 = vmul.f32 %v1394_v29, %v1092_v30 }
 0x800   : > { %v1106_v33 = vadd.f32 %v1395_v31, %v1099_v32 }
 0x802   : > { %v1107_v34 = vpack.c.bf16 %v1106_v33, %v1106_v33 }
 0x804   : > { %1516 = vmatmul.mubr.msk.bf16.vlgmr.msra.gmra.mxu0 %vm440_vm0, %v1107_v34 }
 0x8c4   : > { %v1168_v43 = vpop.f32.mrf.mxu0 }
 0x8c5   : > { %v1169_v44 = vadd.f32 %v1396_v42, %v1168_v43 }
 0x8c6   : > { %v1517_v45 = vpop.f32.mrf.mxu0 }
 0x8c7   : > { %v1175_v46 = vmul.f32 0.044715, %v1169_v44  ;;  %v1174_v8 = vmul.f32 0.5, %v1169_v44 }
 0x8c8   : > { %v1171_v47 = vpop.f32.mrf.mxu0 }
 0x8c9   : > { %v1176_v48 = vmul.f32 %v1175_v46, %v1169_v44 }
 0x8ca   : > { %v1518_v49 = vpop.f32.mrf.mxu0 }
 0x8cb   : > { %v1177_v50 = vmul.f32 %v1176_v48, %v1169_v44 }
 0x8cd   : > { %v1178_v51 = vadd.f32 %v1177_v50, %v1169_v44 }
 0x8cf   : > { %v1179_v52 = vmul.f32 0.7978846, %v1178_v51 }
 0x8d1   : > { %1628 = vtanh.f32 %v1179_v52 }
 0x8de   : > { %v1629_v53 = vpop.eup %1628 }
 0x8df   : > { %v1181_v54 = vadd.f32 1.0, %v1629_v53 }
 0x8e1   : > { %v1182_v55 = vmul.f32 %v1181_v54, %v1174_v8 }
 0x8e3   : > { %v1183_v56 = vpack.c.bf16 %v1182_v55, %v1182_v55 }
 0x8e5   : > { %1536 = vmatmul.mubr.bf16.vlgmr.msra.gmra.mxu1 %v1183_v56 }
 0x9a5   : > { %v1289_v58 = vpop.f32.mrf.mxu1 }
 0x9a6   : > { %v1290_v59 = vadd.f32 %v1400_v57, %v1289_v58 }
 0x9a7   : > { %v1537_v60 = vpop.f32.mrf.mxu1 }
 0x9a8   : > { %v1295_v61 = vadd.f32 %v1290_v59, %v1942_v14 }
 0x9a9   : > { %v1292_v62 = vpop.f32.mrf.mxu1 }
 0x9aa   : > { %1296 = vst.msk [vmem:[%s431_s22] sm:$0xff] %vm440_vm0, %v1295_v61 }
 0x9ab   : > { %v1538_v63 = vpop.f32.mrf.mxu1 }
 0x9ac   : > { %1643 = shalt.err (!%p1640_p3)
}
 0x9ad   : > { %s1644_s21 = scalar_lea.hbm %s2005_s1, 128  ;;  %s1648_s24 = scalar_lea.hbm %s2060_s13, 256 }
 0x9ae   : > { %p1645_p4 = scmp.ne.s32.totalorder %s2005_s1, %s1644_s21  ;;  %p1649_p9 = scmp.lt.s32.totalorder %s2005_s1, %s2060_s13 }
 0x9af   : > { %p1650_p10 = scmp.lt.s32.totalorder %s1648_s24, %s1644_s21 }
 0x9b0   : > { %p1646_p7 = pnand %p1645_p4, %p1817_p5 }
 0x9b1   : > { %p1651_p11 = por %p1650_p10, %p1649_p9 }
 0x9b2   : > { %p1647_p8 = pneg %p1646_p7 }
 0x9b4   : > { %p1652_p12 = pnand %p1651_p11, %p1647_p8 }
 0x9b6   : > { %1655 = shalt.err (!%p1652_p12)
}
 0x9b7   : > { %1539 = dma.vmem_to_hbm [thread:$0]  (%p1817_p5), %s2007_s23, 128, %s2005_s1, %s1298_s29  }
 0x9b8 PF: > { %p1545_p13 = scmp.ge.s32.totalorder %s1690_s28, 2  ;;  %s1323_s15 = sand.u32 1, %s1678_s25  }
 0x9b9   : > { %s1324_s2 = scalar_lea.sflag [#allocation4], %s1323_s15 }
 0x9ba   : > { %p1542_p0 = pnand %p1545_p13, %p1821_p6 }
 0x9bc   : > { %p1543_p1 = pneg %p1542_p0 }
 0x9be   : > { %1673 = dma.done.wait (%p1543_p1), %s1324_s2, 128  }
 0x9bf   : > { %1675 = vsyncadd (%p1543_p1), %s1324_s2, 4294967168  ;;  %p23_p2 = scmp.ge.s32.totalorder %s1804_s14, 4   ;;  %s2069_s25 = smov %s1682_s26 }
 0x9c0   : > { %s2070_s26 = smov %s1686_s27  ;;  %s2071_s27 = smov %s1815_s17 }
 0x9c1   : > { %s2072_s28 = smov %s1804_s14  ;;  %25 = sbr.rel (!%p23_p2) target bundleno = 7 (0x7), region = 107 }
 0x9c6   :  { %1329 = vsyncpa [#allocation4], 1 }
 0x9c7   :  { %1331 = vsyncpa [#allocation4 + $0x1], 1 }

</bundles_post_ra>
